<compile_context>
chip_gen: v6e
topology: v6e:2x2x1
jax: 0.10.0
libtpu: 0.0.40
codegen_flags: <defaults>
</compile_context>

<pallas_src>
import jax
import jax.numpy as jnp
from jax.experimental import pallas as pl
from jax.experimental.pallas import tpu as pltpu


LANE = 128


def _round_up(x, m):
    return ((x + m - 1) // m) * m


def _pick_tile_n(n_tot):
    """Token-axis tile: multiple of 16 (bf16 sublane packing), 128/256 for
    real ViT sequence lengths so there are >= 2 tiles to pipeline / shard."""
    if n_tot <= 128:
        return _round_up(n_tot, 16)
    if n_tot <= 512:
        return 128
    return 256


def embed_kernel(patch_ref, w_ref, pos_ref, out_ref):
    # patch_ref: (1, TILE_N, K)     bf16  (row 0 of the sequence is a zero
    #                                      "cls patch")
    # w_ref:     (K, E_pad)         bf16  (constant block index -> resident)
    # pos_ref:   (N_pad, E_pad)     f32   (whole table, DMA'd once; row 0 is
    #                                      cls+pos[0], rows 1..N are pos+bias)
    # out_ref:   (1, TILE_N, E_pad) f32
    t = pl.program_id(1)
    tile_n = out_ref.shape[1]
    row0 = pl.multiple_of(t * tile_n, tile_n)
    y = jnp.dot(patch_ref[0], w_ref[...],
                preferred_element_type=jnp.float32)          # MXU, f32 acc
    out_ref[0] = y + pos_ref[pl.ds(row0, tile_n), :]         # VPU add


def extract_patches(x, patch_size):
    """(B, C, H, W) -> (B, N, C*P*P) in conv2d-compatible (c, ph, pw) order."""
    B, C, H, W = x.shape
    P = patch_size
    Hp, Wp = H // P, W // P
    x = x.reshape(B, C, Hp, P, Wp, P)
    x = jnp.transpose(x, (0, 2, 4, 1, 3, 5))          # (B, Hp, Wp, C, P, P)
    return x.reshape(B, Hp * Wp, C * P * P)


def embed_layer(x, conv_w, conv_b, cls_token, pos_embedding, patch_size):
    """x: (B, C, H, W) float32.  Returns (B, N+1, E) float32."""
    B, C, H, W = x.shape
    E = conv_w.shape[0]
    P = patch_size
    N = (H // P) * (W // P)
    N_tot = N + 1
    K = C * P * P

    E_pad = _round_up(E, LANE)
    TILE_N = _pick_tile_n(N_tot)
    N_pad = _round_up(N_tot, TILE_N)
    n_tiles = N_pad // TILE_N

    # Patch pixels, with a leading all-zero "cls patch" row and zero tail
    # padding up to N_pad.  The zero row makes the kernel emit cls+pos[0] for
    # token 0 through the same matmul+add path, so no concat epilogue.
    patches = extract_patches(x, P)                              # (B, N, K) f32
    patches = jnp.pad(patches, ((0, 0), (1, N_pad - N_tot), (0, 0)))
    patches = patches.astype(jnp.bfloat16)                       # (B, N_pad, K)

    # Conv weight as a (K, E_pad) matmul matrix, bf16 for the MXU.
    w_mat = conv_w.reshape(E, K).T.astype(jnp.bfloat16)          # (K, E)
    if E_pad != E:
        w_mat = jnp.pad(w_mat, ((0, 0), (0, E_pad - E)))

    # Additive table per token row (kept f32 so bias/pos add is exact):
    #   row 0      : cls_token + pos[0]
    #   rows 1..N  : pos[i] + conv bias
    #   rows > N   : zeros (sliced away below)
    pos = pos_embedding.reshape(N_tot, E).astype(jnp.float32)
    pos_add = jnp.concatenate(
        [cls_token.reshape(1, E) + pos[:1], pos[1:] + conv_b.reshape(1, E)],
        axis=0)                                                  # (N_tot, E)
    pos_add = jnp.pad(pos_add, ((0, N_pad - N_tot), (0, E_pad - E)))

    flops = 2 * B * N_pad * K * E_pad
    bytes_accessed = (B * N_pad * K * 2          # patches (bf16)
                      + K * E_pad * 2            # weight (bf16, once)
                      + N_pad * E_pad * 4        # pos table (f32, once)
                      + B * N_pad * E_pad * 4)   # output (f32)

    out_padded = pl.pallas_call(
        embed_kernel,
        out_shape=jax.ShapeDtypeStruct((B, N_pad, E_pad), jnp.float32),
        grid_spec=pltpu.PrefetchScalarGridSpec(
            num_scalar_prefetch=0,
            grid=(B, n_tiles),
            in_specs=[
                # Patch tile: new block every grid step.
                pl.BlockSpec((1, TILE_N, K), lambda b, t: (b, t, 0)),
                # Weight: constant block index -> single DMA, VMEM-resident.
                pl.BlockSpec((K, E_pad), lambda b, t: (0, 0)),
                # pos(+bias,+cls): whole table, constant block index -> single
                # DMA total (not re-fetched per batch element).
                pl.BlockSpec((N_pad, E_pad), lambda b, t: (0, 0)),
            ],
            out_specs=pl.BlockSpec((1, TILE_N, E_pad), lambda b, t: (b, t, 0)),
        ),
        compiler_params=pltpu.CompilerParams(
            dimension_semantics=("parallel", "parallel"),
            # Let XLA fuse the reshape/transpose/pad/cast chain that produces
            # the patch slab into the kernel's input DMA (operand 0).
            allow_input_fusion=[True, False, False],
        ),
        cost_estimate=pl.CostEstimate(
            flops=flops, transcendentals=0, bytes_accessed=bytes_accessed),
    )(patches, w_mat, pos_add)

    # TODO(synk): for very large embed dims (E_pad >= ~4096, K ~ 768) add an
    # E-tile grid axis so the resident weight/pos/output tiles stay within
    # v7x's 32 MiB scoped-VMEM default; typical ViT shapes fit comfortably.
    return out_padded[:, :N_tot, :E]                             # (B, N+1, E)


def embed_layer_ref(x, conv_w, conv_b, cls_token, pos_embedding, patch_size):
    """Pure-JAX (f32) reference matching the PyTorch forward."""
    B, C, H, W = x.shape
    E = conv_w.shape[0]
    P = patch_size
    N = (H // P) * (W // P)
    K = C * P * P
    patches = extract_patches(x, P)                       # (B, N, K)
    y = patches @ conv_w.reshape(E, K).T + conv_b         # (B, N, E)
    cls = jnp.broadcast_to(cls_token.reshape(1, 1, E), (B, 1, E))
    out = jnp.concatenate([cls, y], axis=1)               # (B, N+1, E)
    return out + pos_embedding.reshape(1, N + 1, E)


if __name__ == "__main__":
    # Small ViT-ish config: batch=2, channels=4, img=16, patch=4, embed=32
    B, C, IMG, P, E = 2, 4, 16, 4, 32
    N = (IMG // P) ** 2
    K = C * P * P

    key = jax.random.PRNGKey(0)
    kx, kw, kb, kc, kp = jax.random.split(key, 5)

    x = jax.random.normal(kx, (B, C, IMG, IMG), dtype=jnp.float32)
    conv_w = jax.random.uniform(kw, (E, C, P, P), dtype=jnp.float32,
                                minval=-0.1, maxval=0.1)
    conv_b = jax.random.uniform(kb, (E,), dtype=jnp.float32,
                                minval=-0.1, maxval=0.1)
    cls_token = jax.random.uniform(kc, (1, 1, E), dtype=jnp.float32)
    pos_embedding = jax.random.uniform(kp, (1, N + 1, E), dtype=jnp.float32)

    out = embed_layer(x, conv_w, conv_b, cls_token, pos_embedding, P)
    out = jax.block_until_ready(out)

    ref = embed_layer_ref(x, conv_w, conv_b, cls_token, pos_embedding, P)
    assert out.shape == (B, N + 1, E), out.shape
    # bf16 matmul operands (f32 accumulate) -> loosened tolerance vs. f32 ref.
    assert jnp.allclose(out, ref, atol=2e-2, rtol=2e-2), "mismatch vs reference"

    print("KERNEL_OK")
</pallas_src>

<mosaic_0001>
module attributes {stable_mosaic.version = 11 : i64} {
  func.func @embed_kernel(%arg0: i32, %arg1: i32, %arg2: memref<1x32x64xbf16, #tpu.memory_space<vmem>>, %arg3: memref<64x128xbf16, #tpu.memory_space<vmem>>, %arg4: memref<32x128xf32, #tpu.memory_space<vmem>>, %arg5: memref<1x32x128xf32, #tpu.memory_space<vmem>>) attributes {dimension_semantics = [#tpu.dimension_semantics<parallel>, #tpu.dimension_semantics<parallel>], iteration_bounds = array<i64: 2, 1>, scalar_prefetch = 0 : i64, scratch_operands = 0 : i64, tpu.core_type = #tpu.core_type<tc>, window_params = [{transform_indices = @transform_0, window_bounds = array<i64: 1, 32, 64>}, {pipeline_mode = #tpu.pipeline_mode<synchronous>, transform_indices = @transform_1, window_bounds = array<i64: 64, 128>}, {pipeline_mode = #tpu.pipeline_mode<synchronous>, transform_indices = @transform_2, window_bounds = array<i64: 32, 128>}, {transform_indices = @transform_3, window_bounds = array<i64: 1, 32, 128>}]} {
    %c32_i32 = arith.constant 32 : i32
    %0 = arith.muli %arg1, %c32_i32 : i32
    %1 = tpu.assume_multiple %0, 32 : i32
    %c0 = arith.constant 0 : index
    %c0_0 = arith.constant 0 : index
    %c0_1 = arith.constant 0 : index
    %2 = vector.load %arg2[%c0, %c0_0, %c0_1] : memref<1x32x64xbf16, #tpu.memory_space<vmem>>, vector<1x32x64xbf16>
    %3 = vector.shape_cast %2 : vector<1x32x64xbf16> to vector<32x64xbf16>
    %c0_2 = arith.constant 0 : index
    %c0_3 = arith.constant 0 : index
    %4 = vector.load %arg3[%c0_2, %c0_3] : memref<64x128xbf16, #tpu.memory_space<vmem>>, vector<64x128xbf16>
    %cst = arith.constant dense<0.000000e+00> : vector<32x128xf32>
    %5 = tpu.matmul %3, %4, %cst {dimension_numbers = #tpu.dot_dimension_numbers<[1], [0], [0], [1], [0, 0, 1, 1], [], []>} : vector<32x64xbf16>, vector<64x128xbf16>, vector<32x128xf32> -> vector<32x128xf32>
    %6 = arith.index_cast %1 : i32 to index
    %c0_4 = arith.constant 0 : index
    %7 = vector.load %arg4[%6, %c0_4] : memref<32x128xf32, #tpu.memory_space<vmem>>, vector<32x128xf32>
    %8 = arith.addf %5, %7 : vector<32x128xf32>
    %c0_5 = arith.constant 0 : index
    %c0_6 = arith.constant 0 : index
    %c0_7 = arith.constant 0 : index
    %9 = vector.load %arg5[%c0_5, %c0_6, %c0_7] : memref<1x32x128xf32, #tpu.memory_space<vmem>>, vector<1x32x128xf32>
    %10 = vector.shape_cast %9 : vector<1x32x128xf32> to vector<32x128xf32>
    %11 = vector.shape_cast %8 : vector<32x128xf32> to vector<1x32x128xf32>
    tpu.vector_store %arg5[%c0_5, %c0_6, %c0_7], %11 {strides = array<i32>} : memref<1x32x128xf32, #tpu.memory_space<vmem>>, vector<1x32x128xf32>,
    return
  }
  func.func @transform_0(%arg0: i32, %arg1: i32) -> (i32, i32, i32) {
    %c0_i32 = arith.constant 0 : i32
    %c0_i32_0 = arith.constant 0 : i32
    return %arg0, %arg1, %c0_i32 : i32, i32, i32
  }
  func.func @transform_1(%arg0: i32, %arg1: i32) -> (i32, i32) {
    %c0_i32 = arith.constant 0 : i32
    %c0_i32_0 = arith.constant 0 : i32
    %c0_i32_1 = arith.constant 0 : i32
    return %c0_i32, %c0_i32_0 : i32, i32
  }
  func.func @transform_2(%arg0: i32, %arg1: i32) -> (i32, i32) {
    %c0_i32 = arith.constant 0 : i32
    %c0_i32_0 = arith.constant 0 : i32
    %c0_i32_1 = arith.constant 0 : i32
    return %c0_i32, %c0_i32_0 : i32, i32
  }
  func.func @transform_3(%arg0: i32, %arg1: i32) -> (i32, i32, i32) {
    %c0_i32 = arith.constant 0 : i32
    %c0_i32_0 = arith.constant 0 : i32
    return %arg0, %arg1, %c0_i32 : i32, i32, i32
  }
}

</mosaic_0001>

<bundles_post_ra>
// kernel: tpu_custom_call.1
= control target key start
LH: loop header
LB: loop body
LE: loop exit
PB: predicated region body
PF: predicated region fallthrough
CT: control target
= control target key end

     0   :  { %8 = vsyncpa [#allocation3], 0  ;;  %s1008_s0 = inlined_call_operand.hbm [shape: bf16[2,32,64], index: 0, kind: input, shape index: {}]   ;;  %s1009_s1 = inlined_call_operand.hbm [shape: bf16[64,128], index: 1, kind: input, shape index: {}]   ;;  %s1010_s2 = inlined_call_operand.hbm [shape: f32[32,128], index: 2, kind: input, shape index: {}]   ;;  %s1011_s3 = inlined_call_operand.hbm [shape: f32[2,32,128], index: 3, kind: output, shape index: {}]  }
   0x1   :  { %10 = vsyncpa [#allocation3 + $0x1], 0 }
   0x2   :  { %11 = vsyncpa [#allocation6], 0 }
   0x3   :  { %12 = vsyncpa [#allocation4], 0 }
   0x4   :  { %14 = vsyncpa [#allocation4 + $0x1], 0  ;;  %s813_s12 = smov 0   ;;  %s815_s13 = smov 0  }
   0x5   :  { %s817_s14 = smov 0   ;;  %s819_s15 = smov 0  }
   0x6   :  { %s821_s16 = smov 0   ;;  %s823_s17 = smov 0  }
   0x7 LB: > { %s475_s18 = sadd.s32 4294967295, %s781_s17   ;;  %s476_s19 = sadd.s32 4294967294, %s781_s17   ;;  %s781_s17 = sphi %s823_s17, %s20_s17   ;;  %s777_s16 = sphi %s821_s16, %s1028_s16   ;;  %s773_s15 = sphi %s819_s15, %s1027_s15   ;;  %s769_s14 = sphi %s817_s14, %s1026_s14   ;;  %s765_s13 = sphi %s815_s13, %s1025_s13   ;;  %s761_s12 = sphi %s813_s12, %s1024_s12  }
   0x8   : > { %p54_p0 = scmp.ne.s32.totalorder %s765_s13, %s761_s12  ;;  %p847_p1 = scmp.eq.s32.totalorder %s475_s18, 0 }
   0x9   : > { %p851_p2 = scmp.eq.s32.totalorder %s475_s18, 1  ;;  %p128_p3 = scmp.eq.s32.totalorder %s476_s19, 1 }
   0xa   : > { %p857_p4 = por %p847_p1, %p54_p0  ;;  %p477_p5 = scmp.ge.s32.totalorder %s781_s17, 1 }
   0xb   : > { %p862_p6 = por %p128_p3, %p54_p0  ;;  %p135_p7 = scmp.lt.s32.totalorder %s781_s17, 3 }
   0xc   : > { %s783_s25 = smov [#allocation5]   ;;  %s784_s28 = smov [#allocation7]  }
   0xd   : > { %s1016_s23 = scalar_select %p862_p6, 1, 0 }
   0xe   : > { %p867_p8 = pnand %p477_p5, %p135_p7  ;;  %s147_s26 = sshll.u32 %s783_s25, 4  ;;  %s148_s26 = int_to_ptr.vmem [resolvable:$true] %s147_s26 }
   0xf   : > { %s160_s29 = sshll.u32 %s784_s28, 4  ;;  %s628_s30 = scalar_lea.vmem %s148_s26, 512  ;;  %s161_s29 = int_to_ptr.vmem [resolvable:$true] %s160_s29 }
  0x10   : > { %p534_p9 = pneg %p867_p8  ;;  %p629_p13 = scmp.ne.s32.totalorder %s148_s26, %s628_s30 }
  0x11   : > { %p636_p5 = scmp.lt.s32.totalorder %s148_s26, %s148_s26  ;;  %p637_p7 = scmp.lt.s32.totalorder %s628_s30, %s628_s30 }
  0x12   : > { %p876_p11 = pnand %p534_p9, %p847_p1 }
  0x13   : > { %p638_p10 = por %p637_p7, %p636_p5 }
  0x14   : > { %p619_p12 = pneg %p876_p11 }
  0x16   : > { %p631_p0 = pnand %p629_p13, %p619_p12 }
  0x18   : > { %p632_p3 = pneg %p631_p0 }
  0x1a   : > { %p639_p9 = pnand %p638_p10, %p632_p3 }
  0x1c   : > { %642 = shalt.err (!%p639_p9)
}
  0x1d   : > { %s1012_s4 = smov 64   ;;  %s786_s5 = smov 4  }
  0x1e   : > { %537 = dma.hbm_to_vmem [thread:$0]  (!%p876_p11), %s1009_s1, 512, %s148_s26, [#allocation6], %s1012_s4, %s1012_s4, %s786_s5  }
  0x1f   : > { %s654_s8 = scalar_lea.vmem %s161_s29, 512  ;;  %p662_p10 = scmp.lt.s32.totalorder %s161_s29, %s161_s29 }
  0x20   : > { %p655_p13 = scmp.ne.s32.totalorder %s161_s29, %s654_s8  ;;  %p663_p3 = scmp.lt.s32.totalorder %s654_s8, %s654_s8 }
  0x22   : > { %p657_p0 = pnand %p655_p13, %p619_p12  ;;  %p664_p7 = por %p663_p3, %p662_p10 }
  0x24   : > { %p658_p5 = pneg %p657_p0 }
  0x26   : > { %p665_p9 = pnand %p664_p7, %p658_p5 }
  0x28   : > { %668 = shalt.err (!%p665_p9)
}
  0x29   : > { %s787_s9 = smov 128   ;;  %s788_s10 = smov 8  }
  0x2a   : > { %540 = dma.hbm_to_vmem [thread:$0]  (!%p876_p11), %s1010_s2, 512, %s161_s29, [#allocation6], %s787_s9, %s787_s9, %s788_s10  }
  0x2b   : > { %s32_s19 = sadd.s32 1, %s777_s16  ;;  %s41_s25 = sadd.s32 1, %s769_s14 }
  0x2c   : > { %p34_p12 = scmp.ge.s32.totalorder %s32_s19, 2  ;;  %p48_p13 = scmp.ne.s32.totalorder %s769_s14, %s765_s13 }
  0x2d   : > { %p49_p0 = scmp.eq.s32.totalorder %s781_s17, 0  ;;  %p551_p5 = scmp.lt.s32.totalorder %s781_s17, 2 }
  0x2e   : > { %s1030_s19 = smov (%p34_p12, %s32_s19), 0  ;;  %p911_p3 = por %p851_p2, %p48_p13 }
  0x2f   : > { %p50_p10 = por %p49_p0, %p48_p13  ;;  %s36_s27 = ssub.s32 %s777_s16, %s1030_s19 }
  0x30   : > { %s174_s28 = sand.u32 1, %s769_s14   ;;  %p39_p7 = scmp.eq.s32.totalorder %s36_s27, 0 }
  0x31   : > { %s481_s29 = sshll.u32 %s174_s28, 4  ;;  %s502_s30 = sshll.u32 %s777_s16, 8 }
  0x32   : > { %s920_s6 = scalar_select %p39_p7, %s769_s14, %s41_s25  }
  0x33   : > { %s186_s9 = scalar_lea.hbm %s1008_s0, %s502_s30  ;;  %s178_s10 = scalar_lea.vmem [#allocation2], %s481_s29 }
  0x34   : > { %s187_s11 = sshll.u32 %s178_s10, 4  ;;  %p927_p11 = pnand %p551_p5, %p50_p10  ;;  %s188_s11 = int_to_ptr.vmem [resolvable:$true] %s187_s11 }
  0x35   : > { %s175_s18 = scalar_lea.sflag [#allocation3], %s174_s28  ;;  %s682_s27 = scalar_lea.vmem %s188_s11, 256 }
  0x36   : > { %p671_p2 = pneg %p927_p11  ;;  %p683_p9 = scmp.ne.s32.totalorder %s188_s11, %s682_s27 }
  0x37   : > { %s789_s25 = smov [#allocation2]  }
  0x38   : > { %p685_p12 = pnand %p683_p9, %p671_p2  ;;  %s687_s4 = sshll.u32 %s789_s25, 4  ;;  %s688_s4 = int_to_ptr.vmem [resolvable:$false] %s687_s4 }
  0x39   : > { %s689_s30 = scalar_lea.vmem %s688_s4, 512  ;;  %p690_p0 = scmp.lt.s32.totalorder %s188_s11, %s688_s4 }
  0x3a   : > { %p686_p13 = pneg %p685_p12  ;;  %p691_p7 = scmp.lt.s32.totalorder %s689_s30, %s682_s27 }
  0x3c   : > { %p692_p6 = por %p691_p7, %p690_p0 }
  0x3e   : > { %p693_p5 = pnand %p692_p6, %p686_p13 }
  0x40   : > { %696 = shalt.err (!%p693_p5)
}
  0x41   : > { %s1021_s29 = smov 64   ;;  %199 = sbr.rel (%p867_p8) target bundleno = 305 (0x131), region = 32 }
  0x42   : > { %544 = dma.hbm_to_vmem [thread:$0]  (!%p927_p11), %s186_s9, 256, %s188_s11, %s175_s18, %s1021_s29, %s1021_s29, %s786_s5  }
  0x43   : > { %s941_s28 = sand.u32 (!%p867_p8), 1, %s765_s13  }
  0x44   : > { %s485_s4 = sshll.u32 (!%p867_p8), %s941_s28, 4  ;;  %s202_s7 = scalar_lea.sflag (!%p867_p8), [#allocation3], %s941_s28 }
  0x45   : > { %s205_s8 = scalar_lea.vmem (!%p867_p8), [#allocation2], %s485_s4 }
  0x46   : > { %748 = dma.done.wait (%p857_p4), %s202_s7, 256  }
  0x47   : > { %750 = vsyncadd (%p857_p4), %s202_s7, 4294967040 }
  0x48   : > { %752 = dma.done.wait (%p847_p1), [#allocation6], 1024  }
  0x49   : > { %754 = vsyncadd (%p847_p1), [#allocation6], 4294966272  ;;  %v611_v0 = vld [vmem:[#allocation5 + $0x18] sm:$0xff]   ;;  %v612_v1 = vld [vmem:[#allocation5 + $0x10] sm:$0xff]   ;;  %vm291_vm0 = vcmask 523264   ;;  %s488_s20 = sshll.u32 %s941_s28, 5 }
  0x4a   : > { %510 = vmatprep.subr.bf16.mxu0 %v611_v0  ;;  %v613_v2 = vld [vmem:[#allocation5 + $0x8] sm:$0xff]   ;;  %v615_v3 = vld [vmem:[%s205_s8] sm:$0xff]   ;;  %s235_s22 = scalar_lea.vmem [#allocation8], %s488_s20  ;;  %v256_v11 = vld [vmem:[#allocation7 + $0x18] sm:$0xff]  ;;  %s503_s5 = sshll.u32 %s773_s15, 9 }
  0x4b   : > { %511 = vmatpush3.bf16.msra.mxu0 %v611_v0  ;;  %518 = vmatprep.mubr.msk.bf16.mxu0 %vm291_vm0, %v615_v3  ;;  %v614_v4 = vld [vmem:[#allocation5] sm:$0xff]   ;;  %v616_v5 = vld [vmem:[%s205_s8 + $0x8] sm:$0xff]   ;;  %v255_v6 = vld [vmem:[#allocation7 + $0x10] sm:$0xff]  ;;  %s367_s24 = sshll.u32 %s235_s22, 4  ;;  %s960_s11 = scalar_lea.hbm %s1011_s3, %s503_s5  ;;  %s955_s24 = int_to_ptr.vmem [resolvable:$true] %s367_s24 }
  0x4c   : > { %512 = vmatprep.subr.bf16.mxu0 %v612_v1  ;;  %v253_v8 = vld [vmem:[#allocation7] sm:$0xff]  ;;  %v254_v14 = vld [vmem:[#allocation7 + $0x8] sm:$0xff]  ;;  %s352_s21 = scalar_lea.sflag [#allocation4], %s941_s28  ;;  %s697_s15 = scalar_lea.vmem %s955_s24, 512 }
  0x4d   : > { %p698_p1 = scmp.ne.s32.totalorder %s955_s24, %s697_s15  ;;  %s790_s18 = smov [#allocation8]  }
  0x4e   : > { %s701_s27 = sshll.u32 %s790_s18, 4  ;;  %s702_s27 = int_to_ptr.vmem [resolvable:$false] %s701_s27 }
  0x4f   : > { %513 = vmatpush3.bf16.msra.mxu0 %v612_v1  ;;  %p699_p4 = pnand %p698_p1, %p911_p3  ;;  %s703_s25 = scalar_lea.vmem %s702_s27, 1024 }
  0x50   : > { %514 = vmatprep.subr.bf16.mxu0 %v613_v2  ;;  %p704_p8 = scmp.lt.s32.totalorder %s955_s24, %s702_s27  ;;  %p705_p10 = scmp.lt.s32.totalorder %s703_s25, %s697_s15 }
  0x51   : > { %p700_p6 = pneg %p699_p4 }
  0x52   : > { %p706_p11 = por %p705_p10, %p704_p8 }
  0x53   : > { %515 = vmatpush3.bf16.msra.mxu0 %v613_v2 }
  0x54   : > { %516 = vmatprep.subr.bf16.mxu0 %v614_v4  ;;  %p707_p2 = pnand %p706_p11, %p700_p6 }
  0x57   : > { %517 = vmatpush3.bf16.msra.mxu0 %v614_v4 }
  0x5a   : > { %519 = vmatmul.mubr.msk.bf16.vlgmr.msra.gmra.mxu0 %vm291_vm0, %v616_v5 }
 0x11a   : > { %v520_v7 = vpop.f32.mrf.mxu0 }
 0x11b   : > { %v341_v9 = vadd.f32 %v520_v7, %v255_v6 }
 0x11c   : > { %v332_v10 = vpop.f32.mrf.mxu0 }
 0x11d   : > { %349 = vst [vmem:[%s235_s22 + $0x10] sm:$0xff] %v341_v9  ;;  %v333_v12 = vadd.f32 %v332_v10, %v253_v8 }
 0x11e   : > { %v521_v13 = vpop.f32.mrf.mxu0 }
 0x11f   : > { %347 = vst [vmem:[%s235_s22] sm:$0xff] %v333_v12  ;;  %v344_v15 = vadd.f32 %v521_v13, %v256_v11 }
 0x120   : > { %v335_v16 = vpop.f32.mrf.mxu0 }
 0x121   : > { %350 = vst [vmem:[%s235_s22 + $0x18] sm:$0xff] %v344_v15  ;;  %v336_v17 = vadd.f32 %v335_v16, %v254_v14 }
 0x123   : > { %348 = vst [vmem:[%s235_s22 + $0x8] sm:$0xff] %v336_v17 }
 0x124   : > { %710 = shalt.err (!%p707_p2)
}
 0x125   : > { %s711_s30 = scalar_lea.hbm %s960_s11, 512  ;;  %s715_s7 = scalar_lea.hbm %s1011_s3, 1024 }
 0x126   : > { %p712_p9 = scmp.ne.s32.totalorder %s960_s11, %s711_s30  ;;  %p716_p0 = scmp.lt.s32.totalorder %s960_s11, %s1011_s3 }
 0x127   : > { %p717_p7 = scmp.lt.s32.totalorder %s715_s7, %s711_s30 }
 0x128   : > { %p713_p12 = pnand %p712_p9, %p911_p3 }
 0x129   : > { %p718_p5 = por %p717_p7, %p716_p0 }
 0x12a   : > { %p714_p13 = pneg %p713_p12 }
 0x12c   : > { %p719_p1 = pnand %p718_p5, %p714_p13 }
 0x12e   : > { %722 = shalt.err (!%p719_p1)
}
 0x12f   : > { %s791_s22 = smov 128   ;;  %s792_s5 = smov 8  }
 0x130   : > { %532 = dma.vmem_to_hbm [thread:$0]  (%p911_p3), %s955_s24, 512, %s960_s11, %s352_s21, %s791_s22, %s791_s22, %s792_s5  }
 0x131 PF: > { %s382_s9 = sand.u32 1, %s761_s12   ;;  %p1022_p4 = scmp.ne.s32.totalorder %s1016_s23, 0 }
 0x132   : > { %p1023_p6 = scmp.ge.s32.totalorder %s781_s17, 2  ;;  %s383_s10 = scalar_lea.sflag [#allocation4], %s382_s9 }
 0x134   : > { %p546_p8 = pnand %p1023_p6, %p1022_p4 }
 0x136   : > { %p547_p10 = pneg %p546_p8 }
 0x138   : > { %756 = dma.done.wait (%p547_p10), %s383_s10, 512  }
 0x139   : > { %758 = vsyncadd (%p547_p10), %s383_s10, 4294966784  ;;  %s20_s17 = sadd.s32 1, %s781_s17   ;;  %s1024_s12 = smov %s765_s13 }
 0x13a   : > { %p17_p11 = scmp.ge.s32.totalorder %s20_s17, 4   ;;  %s1025_s13 = smov %s769_s14 }
 0x13b   : > { %s1026_s14 = smov %s920_s6  ;;  %s1027_s15 = smov %s777_s16 }
 0x13c   : > { %s1028_s16 = smov %s1030_s19  ;;  %19 = sbr.rel (!%p17_p11) target bundleno = 7 (0x7), region = 86 }
 0x141   :  { %388 = vsyncpa [#allocation3], 1 }
 0x142   :  { %390 = vsyncpa [#allocation3 + $0x1], 1 }
 0x143   :  { %391 = vsyncpa [#allocation6], 1 }
 0x144   :  { %392 = vsyncpa [#allocation4], 1 }
 0x145   :  { %394 = vsyncpa [#allocation4 + $0x1], 1 }

</bundles_post_ra>
